<compile_context>
chip_gen: v5e
topology: v5e:2x2
jax: 0.10.0
libtpu: 0.0.40
codegen_flags: <defaults>
</compile_context>

<pallas_src>
import functools
import math

import jax
import jax.numpy as jnp
from jax import lax
from jax.experimental import pallas as pl
from jax.experimental.pallas import tpu as pltpu


# ---------------------------------------------------------------------------
# helpers
# ---------------------------------------------------------------------------
def _largest_divisor_tile(dim, candidates):
    """Largest candidate that evenly divides `dim`; falls back to the full dim
    (a full-extent block is always legal regardless of the (8,128) rule)."""
    for c in candidates:
        if c <= dim and dim % c == 0:
            return c
    return dim


def _vmem_limit_bytes():
    """Per-generation scoped VMEM budget (conservative fallback for v7x)."""
    try:
        cap = pltpu.get_tpu_info().vmem_capacity_bytes
        return int(min(cap * 3 // 4, 96 * 1024 * 1024))   # 96 MiB v5e/v6e, 48 MiB v7x
    except Exception:
        return 40 * 1024 * 1024


def _choose_proj_tiles(M, NO, K, vmem_limit):
    """VMEM-aware projection tiles (bf16 inputs, f32 accumulator, bf16 output)."""
    big = vmem_limit >= 80 * 1024 * 1024                  # 128-MiB VMEM parts
    tm_cands = (512, 256, 128, 64, 32, 16, 8) if big else (256, 128, 64, 32, 16, 8)
    tn_cands = (1024, 512, 256, 128) if big else (512, 256, 128)
    tk_cands = (512, 256, 128)
    tm = _largest_divisor_tile(M, tm_cands)
    tn = _largest_divisor_tile(NO, tn_cands)
    tk = _largest_divisor_tile(K, tk_cands)

    def fits(tm_, tn_, tk_):
        acc = tm_ * tn_ * 4                               # f32 accumulator
        x_in = 2 * tm_ * tk_ * 2                          # bf16, double-buffered
        w_in = 2 * tk_ * tn_ * 2
        out = 2 * tm_ * tn_ * 2                           # bf16 output
        return acc + x_in + w_in + out <= int(vmem_limit * 0.7)

    while not fits(tm, tn, tk):
        if tn % 256 == 0 and NO % (tn // 2) == 0:
            tn //= 2
        elif tm % 16 == 0 and tm > 8 and M % (tm // 2) == 0:
            tm //= 2
        elif tk % 256 == 0 and K % (tk // 2) == 0:
            tk //= 2
        else:
            break
    return tm, tn, tk


def _choose_attn_tiles(N, width, acc_width, n_acc, out_bytes, vmem_limit):
    """VMEM-aware attention tiles. `width` = q/k/v block lane width,
    `acc_width`/`n_acc` describe the f32 accumulator scratch footprint."""
    big = vmem_limit >= 80 * 1024 * 1024
    tq_cands = (512, 256, 128, 64, 32, 16, 8) if big else (256, 128, 64, 32, 16, 8)
    tkv_cands = (512, 256, 128) if big else (256, 128)
    tq = _largest_divisor_tile(N, tq_cands)
    tkv = _largest_divisor_tile(N, tkv_cands)

    def fits(tq_, tkv_):
        q_in = 2 * tq_ * width * 2                        # bf16, double-buffered
        kv_in = 2 * 2 * tkv_ * width * 2
        out = 2 * tq_ * width * out_bytes
        acc = n_acc * tq_ * acc_width * 4                 # f32 accumulator scratch
        stats = 2 * n_acc * tq_ * 128 * 4                 # lane-padded (tq,1) stats
        return q_in + kv_in + out + acc + stats <= int(vmem_limit * 0.7)

    while not fits(tq, tkv):
        if tkv % 256 == 0 and N % (tkv // 2) == 0:
            tkv //= 2
        elif tq % 16 == 0 and tq > 8 and N % (tq // 2) == 0:
            tq //= 2
        else:
            break
    return tq, tkv


# ---------------------------------------------------------------------------
# Parameter prep (done once, outside the forward pass)
# ---------------------------------------------------------------------------
def prepare_qkv_weight(w_qkv, n_heads, compute_dtype=jnp.bfloat16):
    """Prepare nn.Linear(D, 3D, bias=False) weight once:
       * permute rows so projected columns are head-major (head, per-head dim)
         instead of the module's interleaved '(d h)' order,
       * fold the 1/sqrt(d_head) softmax scale into the Q slab,
       * pre-transpose to (3, D_in, D_out) for a transpose-free matmul kernel,
       * cast to the MXU compute dtype (bf16).
    Returns (3, D_in, D_out)."""
    out3, d_in = w_qkv.shape
    d_model = out3 // 3
    d_head = d_model // n_heads
    w = w_qkv.astype(jnp.float32).reshape(3, d_head, n_heads, d_in)  # row = (s, j, h)
    w = jnp.transpose(w, (0, 2, 1, 3)).reshape(3, d_model, d_in)     # row = (s, h, j)
    w = w.at[0].multiply(1.0 / math.sqrt(d_head))                    # scale folded into Q
    w = jnp.transpose(w, (0, 2, 1))                                  # (3, D_in, D_out)
    return w.astype(compute_dtype)


# ---------------------------------------------------------------------------
# Kernel 1: tiled QKV projection  qkv3[s] = x @ W_prep[s]   (bf16 MXU, f32 acc)
# ---------------------------------------------------------------------------
def _qkv_matmul_kernel(x_ref, w_ref, o_ref, acc_ref):
    k = pl.program_id(3)

    @pl.when(k == 0)
    def _init():
        acc_ref[...] = jnp.zeros_like(acc_ref)

    acc_ref[...] += jnp.dot(x_ref[...], w_ref[0],
                            preferred_element_type=jnp.float32)

    @pl.when(k == pl.num_programs(3) - 1)
    def _finalize():
        o_ref[0] = acc_ref[...].astype(o_ref.dtype)


def qkv_projection_headmajor(x_flat, w_prep_t, *, tm, tn, tk, out_dtype, vmem_limit):
    M, K = x_flat.shape
    S, _, NO = w_prep_t.shape                             # (3, D_in, D_out)
    grid = (S, M // tm, NO // tn, K // tk)
    return pl.pallas_call(
        _qkv_matmul_kernel,
        out_shape=jax.ShapeDtypeStruct((S, M, NO), out_dtype),
        grid_spec=pltpu.PrefetchScalarGridSpec(
            num_scalar_prefetch=0,
            grid=grid,
            in_specs=[
                pl.BlockSpec((tm, tk), lambda s, i, j, k: (i, k)),
                pl.BlockSpec((1, tk, tn), lambda s, i, j, k: (s, k, j)),
            ],
            out_specs=pl.BlockSpec((1, tm, tn), lambda s, i, j, k: (s, i, j)),
            scratch_shapes=[pltpu.VMEM((tm, tn), jnp.float32)],
        ),
        compiler_params=pltpu.CompilerParams(
            dimension_semantics=("parallel", "parallel", "parallel", "arbitrary"),
            vmem_limit_bytes=vmem_limit,
        ),
    )(x_flat, w_prep_t)


# ---------------------------------------------------------------------------
# Kernel 2a: flash attention, heads in the grid (d_head % 128 == 0)
# ---------------------------------------------------------------------------
def _flash_attn_kernel_headgrid(q_ref, k_ref, v_ref, o_ref, m_scr, l_scr, acc_scr):
    ki = pl.program_id(3)

    @pl.when(ki == 0)
    def _init():
        m_scr[...] = jnp.full_like(m_scr, -jnp.inf)
        l_scr[...] = jnp.zeros_like(l_scr)
        acc_scr[...] = jnp.zeros_like(acc_scr)

    q = q_ref[0, 0]                                       # (tq,  d_head), scale pre-folded
    k = k_ref[0, 0]                                       # (tkv, d_head)
    v = v_ref[0, 0]                                       # (tkv, d_head)

    s = lax.dot_general(q, k, (((1,), (1,)), ((), ())),   # QK^T, no k transpose
                        preferred_element_type=jnp.float32)
    m_prev = m_scr[...]
    m_new = jnp.maximum(m_prev, s.max(axis=-1, keepdims=True))
    alpha = jnp.exp(m_prev - m_new)
    p = jnp.exp(s - m_new)
    l_scr[...] = alpha * l_scr[...] + p.sum(axis=-1, keepdims=True)
    acc_scr[...] = alpha * acc_scr[...] + jnp.dot(
        p.astype(v.dtype), v, preferred_element_type=jnp.float32)
    m_scr[...] = m_new

    @pl.when(ki == pl.num_programs(3) - 1)
    def _finalize():
        l = l_scr[...]
        inv = pl.reciprocal(l, approx=True)               # EUP slot
        inv = inv * (2.0 - l * inv)                       # one Newton step
        o_ref[0] = (acc_scr[...] * inv).astype(o_ref.dtype)


# ---------------------------------------------------------------------------
# Kernel 2b: flash attention, static head loop (d_head < 128)
# ---------------------------------------------------------------------------
def _flash_attn_kernel_headloop(q_ref, k_ref, v_ref, o_ref, m_scr, l_scr, acc_scr,
                                *, n_heads):
    ki = pl.program_id(2)

    @pl.when(ki == 0)
    def _init():
        m_scr[...] = jnp.full_like(m_scr, -jnp.inf)
        l_scr[...] = jnp.zeros_like(l_scr)
        acc_scr[...] = jnp.zeros_like(acc_scr)

    q = q_ref[0, 0]                                       # (tq,  D) head-major
    k = k_ref[0, 0]                                       # (tkv, D)
    v = v_ref[0, 0]                                       # (tkv, D)
    d_model = q.shape[-1]
    d_head = d_model // n_heads

    for h in range(n_heads):                              # static unroll over heads
        lo = h * d_head
        qh = q[:, lo:lo + d_head]                         # scale already in the weight
        kh = k[:, lo:lo + d_head]
        vh = v[:, lo:lo + d_head]

        s = lax.dot_general(qh, kh, (((1,), (1,)), ((), ())),
                            preferred_element_type=jnp.float32)   # (tq, tkv)
        m_prev = m_scr[h]
        m_new = jnp.maximum(m_prev, s.max(axis=-1, keepdims=True))
        alpha = jnp.exp(m_prev - m_new)
        p = jnp.exp(s - m_new)
        l_scr[h] = alpha * l_scr[h] + p.sum(axis=-1, keepdims=True)
        acc_scr[h] = alpha * acc_scr[h] + jnp.dot(
            p.astype(vh.dtype), vh, preferred_element_type=jnp.float32)
        m_scr[h] = m_new

    @pl.when(ki == pl.num_programs(2) - 1)
    def _finalize():
        outs = []
        for h in range(n_heads):
            l_h = l_scr[h]
            inv = pl.reciprocal(l_h, approx=True)
            inv = inv * (2.0 - l_h * inv)
            outs.append(acc_scr[h] * inv)
        # single lane-dense D-wide store (head-major columns)
        o_ref[0] = jnp.concatenate(outs, axis=-1).astype(o_ref.dtype)


def multihead_flash_attention(qkv3, n_heads, *, out_dtype, vmem_limit):
    # qkv3: (3, B, N, D), columns head-major per slab, scale folded into q.
    _, B, N, D = qkv3.shape
    d_head = D // n_heads
    out_bytes = jnp.dtype(out_dtype).itemsize
    big = vmem_limit >= 80 * 1024 * 1024

    if d_head % 128 == 0:
        # -------- heads promoted into the grid (per-head d_head-wide blocks) --
        tq, tkv = _choose_attn_tiles(N, d_head, d_head, 1, out_bytes, vmem_limit)
        kv_kwargs = {}
        if big and (N // tkv) >= 3:
            kv_kwargs = dict(pipeline_mode=pl.Buffered(3))   # deeper k/v pipelining
        grid = (B, n_heads, N // tq, N // tkv)
        q_spec = pl.BlockSpec((1, 1, tq, d_head), lambda b, h, qi, ki: (0, b, qi, h))
        k_spec = pl.BlockSpec((1, 1, tkv, d_head), lambda b, h, qi, ki: (1, b, ki, h),
                              **kv_kwargs)
        v_spec = pl.BlockSpec((1, 1, tkv, d_head), lambda b, h, qi, ki: (2, b, ki, h),
                              **kv_kwargs)
        o_spec = pl.BlockSpec((1, tq, d_head), lambda b, h, qi, ki: (b, qi, h))
        kernel = _flash_attn_kernel_headgrid
        scratch = [pltpu.VMEM((tq, 1), jnp.float32),
                   pltpu.VMEM((tq, 1), jnp.float32),
                   pltpu.VMEM((tq, d_head), jnp.float32)]
        dims = ("parallel", "parallel", "parallel", "arbitrary")
    else:
        # -------- static head loop over head-major column slabs ---------------
        d_pad = -(-d_head // 128) * 128
        tq, tkv = _choose_attn_tiles(N, D, d_pad, n_heads, out_bytes, vmem_limit)
        kv_kwargs = {}
        if big and (N // tkv) >= 3:
            kv_kwargs = dict(pipeline_mode=pl.Buffered(3))
        grid = (B, N // tq, N // tkv)
        q_spec = pl.BlockSpec((1, 1, tq, D), lambda b, qi, ki: (0, b, qi, 0))
        k_spec = pl.BlockSpec((1, 1, tkv, D), lambda b, qi, ki: (1, b, ki, 0),
                              **kv_kwargs)
        v_spec = pl.BlockSpec((1, 1, tkv, D), lambda b, qi, ki: (2, b, ki, 0),
                              **kv_kwargs)
        o_spec = pl.BlockSpec((1, tq, D), lambda b, qi, ki: (b, qi, 0))
        kernel = functools.partial(_flash_attn_kernel_headloop, n_heads=n_heads)
        scratch = [pltpu.VMEM((n_heads, tq, 1), jnp.float32),       # m
                   pltpu.VMEM((n_heads, tq, 1), jnp.float32),       # l
                   pltpu.VMEM((n_heads, tq, d_head), jnp.float32)]  # acc
        dims = ("parallel", "parallel", "arbitrary")

    return pl.pallas_call(
        kernel,
        out_shape=jax.ShapeDtypeStruct((B, N, D), out_dtype),
        grid_spec=pltpu.PrefetchScalarGridSpec(
            num_scalar_prefetch=0,
            grid=grid,
            in_specs=[q_spec, k_spec, v_spec],
            out_specs=o_spec,
            scratch_shapes=scratch,
        ),
        compiler_params=pltpu.CompilerParams(
            dimension_semantics=dims,
            vmem_limit_bytes=vmem_limit,
        ),
    )(qkv3, qkv3, qkv3)   # same fused buffer read through three index_maps


# ---------------------------------------------------------------------------
# SelfAttention forward
# ---------------------------------------------------------------------------
def self_attention_forward(x, w_prep_t, n_heads):
    """x: (B, N, D); w_prep_t: (3, D_in, D_out) from prepare_qkv_weight."""
    B, N, D = x.shape
    d_head = D // n_heads
    M = B * N
    vmem_limit = _vmem_limit_bytes()

    tm, tn, tk = _choose_proj_tiles(M, D, D, vmem_limit)
    x_bf = x.reshape(M, D).astype(jnp.bfloat16)
    qkv3 = qkv_projection_headmajor(x_bf, w_prep_t, tm=tm, tn=tn, tk=tk,
                                    out_dtype=jnp.bfloat16, vmem_limit=vmem_limit)
    qkv3 = qkv3.reshape(3, B, N, D)                       # pure dim split

    o_hm = multihead_flash_attention(qkv3, n_heads,
                                     out_dtype=x.dtype, vmem_limit=vmem_limit)

    # 'bs h n d -> bs n (d h)' channel interleave to match the module's output.
    # TODO(synk): fold this column permutation into the next layer's weight at
    # load time (same trick as prepare_qkv_weight) to avoid the HBM round trip.
    out = o_hm.reshape(B, N, n_heads, d_head).transpose(0, 1, 3, 2).reshape(B, N, D)
    return out


# ---------------------------------------------------------------------------
# Pure-JAX reference (uses the original, un-permuted f32 weight)
# ---------------------------------------------------------------------------
def self_attention_reference(x, w_qkv, n_heads):
    B, N, D = x.shape
    d_head = D // n_heads
    qkv = x @ w_qkv.T
    q, k, v = jnp.split(qkv, 3, axis=2)

    def split_heads(t):   # 'bs n (d h) -> bs h n d'
        return t.reshape(B, N, d_head, n_heads).transpose(0, 3, 1, 2)

    qh, kh, vh = split_heads(q), split_heads(k), split_heads(v)
    s = jnp.einsum("bhqd,bhkd->bhqk", qh, kh) / math.sqrt(d_head)
    p = jax.nn.softmax(s, axis=-1)
    out = jnp.einsum("bhqk,bhkd->bhqd", p, vh)
    return out.transpose(0, 2, 3, 1).reshape(B, N, D)     # 'bs h n d -> bs n (d h)'


if __name__ == "__main__":
    def run_case(B, N, D, H, seed=0):
        key = jax.random.PRNGKey(seed)
        kx, kw = jax.random.split(key)
        x = jax.random.normal(kx, (B, N, D), dtype=jnp.float32)
        # deterministic init of nn.Linear(D, 3D, bias=False) weight
        bound = 1.0 / math.sqrt(D)
        w_qkv = jax.random.uniform(kw, (3 * D, D), dtype=jnp.float32,
                                   minval=-bound, maxval=bound)

        # one-time parameter prep (head-major, scale folded, pre-transposed, bf16)
        w_prep = prepare_qkv_weight(w_qkv, H)

        fwd = jax.jit(self_attention_forward, static_argnums=(2,))
        out = jax.block_until_ready(fwd(x, w_prep, H))

        ref = self_attention_reference(x, w_qkv, H)
        assert out.shape == (B, N, D)
        # bf16 MXU operands (f32 accumulation) -> compare loosely vs f32 reference
        err = float(jnp.max(jnp.abs(out - ref)))
        assert jnp.allclose(out, ref, atol=3e-2, rtol=3e-2), f"mismatch, max err {err}"
        return out

    # small shapes consistent with the module
    run_case(2, 8, 32, 4)      # d_head = 8   -> head-loop attention path
    run_case(1, 16, 256, 2)    # d_head = 128 -> heads-in-grid attention path
    print("KERNEL_OK")
</pallas_src>

<mosaic_0001>
module attributes {stable_mosaic.version = 11 : i64} {
  func.func @_qkv_matmul_kernel(%arg0: i32, %arg1: i32, %arg2: i32, %arg3: i32, %arg4: memref<16x32xbf16, #tpu.memory_space<vmem>>, %arg5: memref<1x32x32xbf16, #tpu.memory_space<vmem>>, %arg6: memref<1x16x32xbf16, #tpu.memory_space<vmem>>, %arg7: memref<16x32xf32, #tpu.memory_space<vmem>>) attributes {dimension_semantics = [#tpu.dimension_semantics<parallel>, #tpu.dimension_semantics<parallel>, #tpu.dimension_semantics<parallel>, #tpu.dimension_semantics<arbitrary>], iteration_bounds = array<i64: 3, 1, 1, 1>, scalar_prefetch = 0 : i64, scratch_operands = 1 : i64, tpu.core_type = #tpu.core_type<tc>, window_params = [{transform_indices = @transform_0, window_bounds = array<i64: 16, 32>}, {transform_indices = @transform_1, window_bounds = array<i64: 1, 32, 32>}, {transform_indices = @transform_2, window_bounds = array<i64: 1, 16, 32>}]} {
    %c0_i32 = arith.constant 0 : i32
    %0 = arith.cmpi eq, %arg3, %c0_i32 : i32
    %1 = arith.extui %0 : i1 to i32
    %c0_i32_0 = arith.constant 0 : i32
    %2 = arith.cmpi ne, %1, %c0_i32_0 : i32
    scf.if %2 {
      %cst_11 = arith.constant 0.000000e+00 : f32
      %13 = vector.broadcast %cst_11 : f32 to vector<16x32xf32>
      %c0_12 = arith.constant 0 : index
      %c0_13 = arith.constant 0 : index
      %14 = vector.load %arg7[%c0_12, %c0_13] : memref<16x32xf32, #tpu.memory_space<vmem>>, vector<16x32xf32>
      tpu.vector_store %arg7[%c0_12, %c0_13], %13 {strides = array<i32>} : memref<16x32xf32, #tpu.memory_space<vmem>>, vector<16x32xf32>,
    } else {
    }
    %c0 = arith.constant 0 : index
    %c0_1 = arith.constant 0 : index
    %3 = vector.load %arg7[%c0, %c0_1] : memref<16x32xf32, #tpu.memory_space<vmem>>, vector<16x32xf32>
    %c0_2 = arith.constant 0 : index
    %c0_3 = arith.constant 0 : index
    %4 = vector.load %arg4[%c0_2, %c0_3] : memref<16x32xbf16, #tpu.memory_space<vmem>>, vector<16x32xbf16>
    %c0_4 = arith.constant 0 : index
    %c0_5 = arith.constant 0 : index
    %c0_6 = arith.constant 0 : index
    %5 = vector.load %arg5[%c0_4, %c0_5, %c0_6] : memref<1x32x32xbf16, #tpu.memory_space<vmem>>, vector<1x32x32xbf16>
    %6 = vector.shape_cast %5 : vector<1x32x32xbf16> to vector<32x32xbf16>
    %cst = arith.constant dense<0.000000e+00> : vector<16x32xf32>
    %7 = tpu.matmul %4, %6, %cst {dimension_numbers = #tpu.dot_dimension_numbers<[1], [0], [0], [1], [0, 0, 1, 1], [], []>} : vector<16x32xbf16>, vector<32x32xbf16>, vector<16x32xf32> -> vector<16x32xf32>
    %8 = arith.addf %3, %7 : vector<16x32xf32>
    %c0_7 = arith.constant 0 : index
    %c0_8 = arith.constant 0 : index
    %9 = vector.load %arg7[%c0_7, %c0_8] : memref<16x32xf32, #tpu.memory_space<vmem>>, vector<16x32xf32>
    tpu.vector_store %arg7[%c0_7, %c0_8], %8 {strides = array<i32>} : memref<16x32xf32, #tpu.memory_space<vmem>>, vector<16x32xf32>,
    %c0_i32_9 = arith.constant 0 : i32
    %10 = arith.cmpi eq, %arg3, %c0_i32_9 : i32
    %11 = arith.extui %10 : i1 to i32
    %c0_i32_10 = arith.constant 0 : i32
    %12 = arith.cmpi ne, %11, %c0_i32_10 : i32
    scf.if %12 {
      %c0_11 = arith.constant 0 : index
      %c0_12 = arith.constant 0 : index
      %13 = vector.load %arg7[%c0_11, %c0_12] : memref<16x32xf32, #tpu.memory_space<vmem>>, vector<16x32xf32>
      %14 = arith.truncf %13 : vector<16x32xf32> to vector<16x32xbf16>
      %c0_13 = arith.constant 0 : index
      %c0_14 = arith.constant 0 : index
      %c0_15 = arith.constant 0 : index
      %15 = vector.load %arg6[%c0_13, %c0_14, %c0_15] : memref<1x16x32xbf16, #tpu.memory_space<vmem>>, vector<1x16x32xbf16>
      %16 = vector.shape_cast %15 : vector<1x16x32xbf16> to vector<16x32xbf16>
      %17 = vector.shape_cast %14 : vector<16x32xbf16> to vector<1x16x32xbf16>
      tpu.vector_store %arg6[%c0_13, %c0_14, %c0_15], %17 {strides = array<i32>} : memref<1x16x32xbf16, #tpu.memory_space<vmem>>, vector<1x16x32xbf16>,
    } else {
    }
    return
  }
  func.func @transform_0(%arg0: i32, %arg1: i32, %arg2: i32, %arg3: i32) -> (i32, i32) {
    %c0_i32 = arith.constant 0 : i32
    return %arg1, %arg3 : i32, i32
  }
  func.func @transform_1(%arg0: i32, %arg1: i32, %arg2: i32, %arg3: i32) -> (i32, i32, i32) {
    %c0_i32 = arith.constant 0 : i32
    return %arg0, %arg3, %arg2 : i32, i32, i32
  }
  func.func @transform_2(%arg0: i32, %arg1: i32, %arg2: i32, %arg3: i32) -> (i32, i32, i32) {
    %c0_i32 = arith.constant 0 : i32
    return %arg0, %arg1, %arg2 : i32, i32, i32
  }
}

module attributes {stable_mosaic.version = 11 : i64} {
  func.func @_flash_attn_kernel_headloop(%arg0: i32, %arg1: i32, %arg2: i32, %arg3: memref<1x1x8x32xbf16, #tpu.memory_space<vmem>>, %arg4: memref<1x1x8x32xbf16, #tpu.memory_space<vmem>>, %arg5: memref<1x1x8x32xbf16, #tpu.memory_space<vmem>>, %arg6: memref<1x8x32xf32, #tpu.memory_space<vmem>>, %arg7: memref<4x8x1xf32, #tpu.memory_space<vmem>>, %arg8: memref<4x8x1xf32, #tpu.memory_space<vmem>>, %arg9: memref<4x8x8xf32, #tpu.memory_space<vmem>>) attributes {dimension_semantics = [#tpu.dimension_semantics<parallel>, #tpu.dimension_semantics<parallel>, #tpu.dimension_semantics<arbitrary>], iteration_bounds = array<i64: 2, 1, 1>, scalar_prefetch = 0 : i64, scratch_operands = 3 : i64, tpu.core_type = #tpu.core_type<tc>, window_params = [{transform_indices = @transform_0, window_bounds = array<i64: 1, 1, 8, 32>}, {transform_indices = @transform_1, window_bounds = array<i64: 1, 1, 8, 32>}, {transform_indices = @transform_2, window_bounds = array<i64: 1, 1, 8, 32>}, {transform_indices = @transform_3, window_bounds = array<i64: 1, 8, 32>}]} {
    %c0_i32 = arith.constant 0 : i32
    %0 = arith.cmpi eq, %arg2, %c0_i32 : i32
    %1 = arith.extui %0 : i1 to i32
    %c0_i32_0 = arith.constant 0 : i32
    %2 = arith.cmpi ne, %1, %c0_i32_0 : i32
    scf.if %2 {
      %cst_98 = arith.constant 0xFF800000 : f32
      %156 = vector.broadcast %cst_98 : f32 to vector<4x8x1xf32>
      %c0_99 = arith.constant 0 : index
      %c0_100 = arith.constant 0 : index
      %c0_101 = arith.constant 0 : index
      %157 = vector.load %arg7[%c0_99, %c0_100, %c0_101] : memref<4x8x1xf32, #tpu.memory_space<vmem>>, vector<4x8x1xf32>
      tpu.vector_store %arg7[%c0_99, %c0_100, %c0_101], %156 {strides = array<i32>} : memref<4x8x1xf32, #tpu.memory_space<vmem>>, vector<4x8x1xf32>,
      %cst_102 = arith.constant 0.000000e+00 : f32
      %158 = vector.broadcast %cst_102 : f32 to vector<4x8x1xf32>
      %c0_103 = arith.constant 0 : index
      %c0_104 = arith.constant 0 : index
      %c0_105 = arith.constant 0 : index
      %159 = vector.load %arg8[%c0_103, %c0_104, %c0_105] : memref<4x8x1xf32, #tpu.memory_space<vmem>>, vector<4x8x1xf32>
      tpu.vector_store %arg8[%c0_103, %c0_104, %c0_105], %158 {strides = array<i32>} : memref<4x8x1xf32, #tpu.memory_space<vmem>>, vector<4x8x1xf32>,
      %cst_106 = arith.constant 0.000000e+00 : f32
      %160 = vector.broadcast %cst_106 : f32 to vector<4x8x8xf32>
      %c0_107 = arith.constant 0 : index
      %c0_108 = arith.constant 0 : index
      %c0_109 = arith.constant 0 : index
      %161 = vector.load %arg9[%c0_107, %c0_108, %c0_109] : memref<4x8x8xf32, #tpu.memory_space<vmem>>, vector<4x8x8xf32>
      tpu.vector_store %arg9[%c0_107, %c0_108, %c0_109], %160 {strides = array<i32>} : memref<4x8x8xf32, #tpu.memory_space<vmem>>, vector<4x8x8xf32>,
    } else {
    }
    %c0 = arith.constant 0 : index
    %c0_1 = arith.constant 0 : index
    %c0_2 = arith.constant 0 : index
    %c0_3 = arith.constant 0 : index
    %3 = vector.load %arg3[%c0, %c0_1, %c0_2, %c0_3] : memref<1x1x8x32xbf16, #tpu.memory_space<vmem>>, vector<1x1x8x32xbf16>
    %4 = vector.shape_cast %3 : vector<1x1x8x32xbf16> to vector<8x32xbf16>
    %c0_4 = arith.constant 0 : index
    %c0_5 = arith.constant 0 : index
    %c0_6 = arith.constant 0 : index
    %c0_7 = arith.constant 0 : index
    %5 = vector.load %arg4[%c0_4, %c0_5, %c0_6, %c0_7] : memref<1x1x8x32xbf16, #tpu.memory_space<vmem>>, vector<1x1x8x32xbf16>
    %6 = vector.shape_cast %5 : vector<1x1x8x32xbf16> to vector<8x32xbf16>
    %c0_8 = arith.constant 0 : index
    %c0_9 = arith.constant 0 : index
    %c0_10 = arith.constant 0 : index
    %c0_11 = arith.constant 0 : index
    %7 = vector.load %arg5[%c0_8, %c0_9, %c0_10, %c0_11] : memref<1x1x8x32xbf16, #tpu.memory_space<vmem>>, vector<1x1x8x32xbf16>
    %8 = vector.shape_cast %7 : vector<1x1x8x32xbf16> to vector<8x32xbf16>
    %9 = vector.extract_strided_slice %4 {offsets = [0, 0], sizes = [8, 8], strides = [1, 1]} : vector<8x32xbf16> to vector<8x8xbf16>
    %10 = vector.extract_strided_slice %6 {offsets = [0, 0], sizes = [8, 8], strides = [1, 1]} : vector<8x32xbf16> to vector<8x8xbf16>
    %11 = vector.extract_strided_slice %8 {offsets = [0, 0], sizes = [8, 8], strides = [1, 1]} : vector<8x32xbf16> to vector<8x8xbf16>
    %cst = arith.constant dense<0.000000e+00> : vector<8x8xf32>
    %12 = tpu.matmul %9, %10, %cst {dimension_numbers = #tpu.dot_dimension_numbers<[1], [1], [0], [0], [0, 0, 1, 0], [], []>} : vector<8x8xbf16>, vector<8x8xbf16>, vector<8x8xf32> -> vector<8x8xf32>
    %c0_12 = arith.constant 0 : index
    %c0_13 = arith.constant 0 : index
    %c0_14 = arith.constant 0 : index
    %13 = vector.load %arg7[%c0_12, %c0_13, %c0_14] : memref<4x8x1xf32, #tpu.memory_space<vmem>>, vector<1x8x1xf32>
    %14 = vector.shape_cast %13 : vector<1x8x1xf32> to vector<8x1xf32>
    %cst_15 = arith.constant dense<0xFF800000> : vector<8xf32>
    %15 = vector.multi_reduction <maximumf>, %12, %cst_15 [1] : vector<8x8xf32> to vector<8xf32>
    %16 = vector.shape_cast %15 : vector<8xf32> to vector<8x1xf32>
    %17 = arith.maximumf %14, %16 : vector<8x1xf32>
    %18 = arith.subf %14, %17 : vector<8x1xf32>
    %19 = math.exp %18 : vector<8x1xf32>
    %20 = vector.broadcast %17 : vector<8x1xf32> to vector<8x8xf32>
    %21 = arith.subf %12, %20 : vector<8x8xf32>
    %22 = math.exp %21 : vector<8x8xf32>
    %c0_16 = arith.constant 0 : index
    %c0_17 = arith.constant 0 : index
    %c0_18 = arith.constant 0 : index
    %23 = vector.load %arg8[%c0_16, %c0_17, %c0_18] : memref<4x8x1xf32, #tpu.memory_space<vmem>>, vector<1x8x1xf32>
    %24 = vector.shape_cast %23 : vector<1x8x1xf32> to vector<8x1xf32>
    %25 = arith.mulf %19, %24 : vector<8x1xf32>
    %cst_19 = arith.constant dense<0.000000e+00> : vector<8xf32>
    %26 = vector.multi_reduction <add>, %22, %cst_19 [1] : vector<8x8xf32> to vector<8xf32>
    %27 = vector.shape_cast %26 : vector<8xf32> to vector<8x1xf32>
    %28 = arith.addf %25, %27 : vector<8x1xf32>
    %c0_20 = arith.constant 0 : index
    %c0_21 = arith.constant 0 : index
    %c0_22 = arith.constant 0 : index
    %29 = vector.load %arg8[%c0_20, %c0_21, %c0_22] : memref<4x8x1xf32, #tpu.memory_space<vmem>>, vector<1x8x1xf32>
    %30 = vector.shape_cast %29 : vector<1x8x1xf32> to vector<8x1xf32>
    %31 = vector.shape_cast %28 : vector<8x1xf32> to vector<1x8x1xf32>
    tpu.vector_store %arg8[%c0_20, %c0_21, %c0_22], %31 {strides = array<i32>} : memref<4x8x1xf32, #tpu.memory_space<vmem>>, vector<1x8x1xf32>,
    %c0_23 = arith.constant 0 : index
    %c0_24 = arith.constant 0 : index
    %c0_25 = arith.constant 0 : index
    %32 = vector.load %arg9[%c0_23, %c0_24, %c0_25] : memref<4x8x8xf32, #tpu.memory_space<vmem>>, vector<1x8x8xf32>
    %33 = vector.shape_cast %32 : vector<1x8x8xf32> to vector<8x8xf32>
    %34 = vector.broadcast %19 : vector<8x1xf32> to vector<8x8xf32>
    %35 = arith.mulf %34, %33 : vector<8x8xf32>
    %36 = arith.truncf %22 : vector<8x8xf32> to vector<8x8xbf16>
    %cst_26 = arith.constant dense<0.000000e+00> : vector<8x8xf32>
    %37 = tpu.matmul %36, %11, %cst_26 {dimension_numbers = #tpu.dot_dimension_numbers<[1], [0], [0], [1], [0, 0, 1, 1], [], []>} : vector<8x8xbf16>, vector<8x8xbf16>, vector<8x8xf32> -> vector<8x8xf32>
    %38 = arith.addf %35, %37 : vector<8x8xf32>
    %c0_27 = arith.constant 0 : index
    %c0_28 = arith.constant 0 : index
    %c0_29 = arith.constant 0 : index
    %39 = vector.load %arg9[%c0_27, %c0_28, %c0_29] : memref<4x8x8xf32, #tpu.memory_space<vmem>>, vector<1x8x8xf32>
    %40 = vector.shape_cast %39 : vector<1x8x8xf32> to vector<8x8xf32>
    %41 = vector.shape_cast %38 : vector<8x8xf32> to vector<1x8x8xf32>
    tpu.vector_store %arg9[%c0_27, %c0_28, %c0_29], %41 {strides = array<i32>} : memref<4x8x8xf32, #tpu.memory_space<vmem>>, vector<1x8x8xf32>,
    %c0_30 = arith.constant 0 : index
    %c0_31 = arith.constant 0 : index
    %c0_32 = arith.constant 0 : index
    %42 = vector.load %arg7[%c0_30, %c0_31, %c0_32] : memref<4x8x1xf32, #tpu.memory_space<vmem>>, vector<1x8x1xf32>
    %43 = vector.shape_cast %42 : vector<1x8x1xf32> to vector<8x1xf32>
    %44 = vector.shape_cast %17 : vector<8x1xf32> to vector<1x8x1xf32>
    tpu.vector_store %arg7[%c0_30, %c0_31, %c0_32], %44 {strides = array<i32>} : memref<4x8x1xf32, #tpu.memory_space<vmem>>, vector<1x8x1xf32>,
    %45 = vector.extract_strided_slice %4 {offsets = [0, 8], sizes = [8, 8], strides = [1, 1]} : vector<8x32xbf16> to vector<8x8xbf16>
    %46 = vector.extract_strided_slice %6 {offsets = [0, 8], sizes = [8, 8], strides = [1, 1]} : vector<8x32xbf16> to vector<8x8xbf16>
    %47 = vector.extract_strided_slice %8 {offsets = [0, 8], sizes = [8, 8], strides = [1, 1]} : vector<8x32xbf16> to vector<8x8xbf16>
    %cst_33 = arith.constant dense<0.000000e+00> : vector<8x8xf32>
    %48 = tpu.matmul %45, %46, %cst_33 {dimension_numbers = #tpu.dot_dimension_numbers<[1], [1], [0], [0], [0, 0, 1, 0], [], []>} : vector<8x8xbf16>, vector<8x8xbf16>, vector<8x8xf32> -> vector<8x8xf32>
    %c1 = arith.constant 1 : index
    %c0_34 = arith.constant 0 : index
    %c0_35 = arith.constant 0 : index
    %49 = vector.load %arg7[%c1, %c0_34, %c0_35] : memref<4x8x1xf32, #tpu.memory_space<vmem>>, vector<1x8x1xf32>
    %50 = vector.shape_cast %49 : vector<1x8x1xf32> to vector<8x1xf32>
    %cst_36 = arith.constant dense<0xFF800000> : vector<8xf32>
    %51 = vector.multi_reduction <maximumf>, %48, %cst_36 [1] : vector<8x8xf32> to vector<8xf32>
    %52 = vector.shape_cast %51 : vector<8xf32> to vector<8x1xf32>
    %53 = arith.maximumf %50, %52 : vector<8x1xf32>
    %54 = arith.subf %50, %53 : vector<8x1xf32>
    %55 = math.exp %54 : vector<8x1xf32>
    %56 = vector.broadcast %53 : vector<8x1xf32> to vector<8x8xf32>
    %57 = arith.subf %48, %56 : vector<8x8xf32>
    %58 = math.exp %57 : vector<8x8xf32>
    %c1_37 = arith.constant 1 : index
    %c0_38 = arith.constant 0 : index
    %c0_39 = arith.constant 0 : index
    %59 = vector.load %arg8[%c1_37, %c0_38, %c0_39] : memref<4x8x1xf32, #tpu.memory_space<vmem>>, vector<1x8x1xf32>
    %60 = vector.shape_cast %59 : vector<1x8x1xf32> to vector<8x1xf32>
    %61 = arith.mulf %55, %60 : vector<8x1xf32>
    %cst_40 = arith.constant dense<0.000000e+00> : vector<8xf32>
    %62 = vector.multi_reduction <add>, %58, %cst_40 [1] : vector<8x8xf32> to vector<8xf32>
    %63 = vector.shape_cast %62 : vector<8xf32> to vector<8x1xf32>
    %64 = arith.addf %61, %63 : vector<8x1xf32>
    %c1_41 = arith.constant 1 : index
    %c0_42 = arith.constant 0 : index
    %c0_43 = arith.constant 0 : index
    %65 = vector.load %arg8[%c1_41, %c0_42, %c0_43] : memref<4x8x1xf32, #tpu.memory_space<vmem>>, vector<1x8x1xf32>
    %66 = vector.shape_cast %65 : vector<1x8x1xf32> to vector<8x1xf32>
    %67 = vector.shape_cast %64 : vector<8x1xf32> to vector<1x8x1xf32>
    tpu.vector_store %arg8[%c1_41, %c0_42, %c0_43], %67 {strides = array<i32>} : memref<4x8x1xf32, #tpu.memory_space<vmem>>, vector<1x8x1xf32>,
    %c1_44 = arith.constant 1 : index
    %c0_45 = arith.constant 0 : index
    %c0_46 = arith.constant 0 : index
    %68 = vector.load %arg9[%c1_44, %c0_45, %c0_46] : memref<4x8x8xf32, #tpu.memory_space<vmem>>, vector<1x8x8xf32>
    %69 = vector.shape_cast %68 : vector<1x8x8xf32> to vector<8x8xf32>
    %70 = vector.broadcast %55 : vector<8x1xf32> to vector<8x8xf32>
    %71 = arith.mulf %70, %69 : vector<8x8xf32>
    %72 = arith.truncf %58 : vector<8x8xf32> to vector<8x8xbf16>
    %cst_47 = arith.constant dense<0.000000e+00> : vector<8x8xf32>
    %73 = tpu.matmul %72, %47, %cst_47 {dimension_numbers = #tpu.dot_dimension_numbers<[1], [0], [0], [1], [0, 0, 1, 1], [], []>} : vector<8x8xbf16>, vector<8x8xbf16>, vector<8x8xf32> -> vector<8x8xf32>
    %74 = arith.addf %71, %73 : vector<8x8xf32>
    %c1_48 = arith.constant 1 : index
    %c0_49 = arith.constant 0 : index
    %c0_50 = arith.constant 0 : index
    %75 = vector.load %arg9[%c1_48, %c0_49, %c0_50] : memref<4x8x8xf32, #tpu.memory_space<vmem>>, vector<1x8x8xf32>
    %76 = vector.shape_cast %75 : vector<1x8x8xf32> to vector<8x8xf32>
    %77 = vector.shape_cast %74 : vector<8x8xf32> to vector<1x8x8xf32>
    tpu.vector_store %arg9[%c1_48, %c0_49, %c0_50], %77 {strides = array<i32>} : memref<4x8x8xf32, #tpu.memory_space<vmem>>, vector<1x8x8xf32>,
    %c1_51 = arith.constant 1 : index
    %c0_52 = arith.constant 0 : index
    %c0_53 = arith.constant 0 : index
    %78 = vector.load %arg7[%c1_51, %c0_52, %c0_53] : memref<4x8x1xf32, #tpu.memory_space<vmem>>, vector<1x8x1xf32>
    %79 = vector.shape_cast %78 : vector<1x8x1xf32> to vector<8x1xf32>
    %80 = vector.shape_cast %53 : vector<8x1xf32> to vector<1x8x1xf32>
    tpu.vector_store %arg7[%c1_51, %c0_52, %c0_53], %80 {strides = array<i32>} : memref<4x8x1xf32, #tpu.memory_space<vmem>>, vector<1x8x1xf32>,
    %81 = vector.extract_strided_slice %4 {offsets = [0, 16], sizes = [8, 8], strides = [1, 1]} : vector<8x32xbf16> to vector<8x8xbf16>
    %82 = vector.extract_strided_slice %6 {offsets = [0, 16], sizes = [8, 8], strides = [1, 1]} : vector<8x32xbf16> to vector<8x8xbf16>
    %83 = vector.extract_strided_slice %8 {offsets = [0, 16], sizes = [8, 8], strides = [1, 1]} : vector<8x32xbf16> to vector<8x8xbf16>
    %cst_54 = arith.constant dense<0.000000e+00> : vector<8x8xf32>
    %84 = tpu.matmul %81, %82, %cst_54 {dimension_numbers = #tpu.dot_dimension_numbers<[1], [1], [0], [0], [0, 0, 1, 0], [], []>} : vector<8x8xbf16>, vector<8x8xbf16>, vector<8x8xf32> -> vector<8x8xf32>
    %c2 = arith.constant 2 : index
    %c0_55 = arith.constant 0 : index
    %c0_56 = arith.constant 0 : index
    %85 = vector.load %arg7[%c2, %c0_55, %c0_56] : memref<4x8x1xf32, #tpu.memory_space<vmem>>, vector<1x8x1xf32>
    %86 = vector.shape_cast %85 : vector<1x8x1xf32> to vector<8x1xf32>
    %cst_57 = arith.constant dense<0xFF800000> : vector<8xf32>
    %87 = vector.multi_reduction <maximumf>, %84, %cst_57 [1] : vector<8x8xf32> to vector<8xf32>
    %88 = vector.shape_cast %87 : vector<8xf32> to vector<8x1xf32>
    %89 = arith.maximumf %86, %88 : vector<8x1xf32>
    %90 = arith.subf %86, %89 : vector<8x1xf32>
    %91 = math.exp %90 : vector<8x1xf32>
    %92 = vector.broadcast %89 : vector<8x1xf32> to vector<8x8xf32>
    %93 = arith.subf %84, %92 : vector<8x8xf32>
    %94 = math.exp %93 : vector<8x8xf32>
    %c2_58 = arith.constant 2 : index
    %c0_59 = arith.constant 0 : index
    %c0_60 = arith.constant 0 : index
    %95 = vector.load %arg8[%c2_58, %c0_59, %c0_60] : memref<4x8x1xf32, #tpu.memory_space<vmem>>, vector<1x8x1xf32>
    %96 = vector.shape_cast %95 : vector<1x8x1xf32> to vector<8x1xf32>
    %97 = arith.mulf %91, %96 : vector<8x1xf32>
    %cst_61 = arith.constant dense<0.000000e+00> : vector<8xf32>
    %98 = vector.multi_reduction <add>, %94, %cst_61 [1] : vector<8x8xf32> to vector<8xf32>
    %99 = vector.shape_cast %98 : vector<8xf32> to vector<8x1xf32>
    %100 = arith.addf %97, %99 : vector<8x1xf32>
    %c2_62 = arith.constant 2 : index
    %c0_63 = arith.constant 0 : index
    %c0_64 = arith.constant 0 : index
    %101 = vector.load %arg8[%c2_62, %c0_63, %c0_64] : memref<4x8x1xf32, #tpu.memory_space<vmem>>, vector<1x8x1xf32>
    %102 = vector.shape_cast %101 : vector<1x8x1xf32> to vector<8x1xf32>
    %103 = vector.shape_cast %100 : vector<8x1xf32> to vector<1x8x1xf32>
    tpu.vector_store %arg8[%c2_62, %c0_63, %c0_64], %103 {strides = array<i32>} : memref<4x8x1xf32, #tpu.memory_space<vmem>>, vector<1x8x1xf32>,
    %c2_65 = arith.constant 2 : index
    %c0_66 = arith.constant 0 : index
    %c0_67 = arith.constant 0 : index
    %104 = vector.load %arg9[%c2_65, %c0_66, %c0_67] : memref<4x8x8xf32, #tpu.memory_space<vmem>>, vector<1x8x8xf32>
    %105 = vector.shape_cast %104 : vector<1x8x8xf32> to vector<8x8xf32>
    %106 = vector.broadcast %91 : vector<8x1xf32> to vector<8x8xf32>
    %107 = arith.mulf %106, %105 : vector<8x8xf32>
    %108 = arith.truncf %94 : vector<8x8xf32> to vector<8x8xbf16>
    %cst_68 = arith.constant dense<0.000000e+00> : vector<8x8xf32>
    %109 = tpu.matmul %108, %83, %cst_68 {dimension_numbers = #tpu.dot_dimension_numbers<[1], [0], [0], [1], [0, 0, 1, 1], [], []>} : vector<8x8xbf16>, vector<8x8xbf16>, vector<8x8xf32> -> vector<8x8xf32>
    %110 = arith.addf %107, %109 : vector<8x8xf32>
    %c2_69 = arith.constant 2 : index
    %c0_70 = arith.constant 0 : index
    %c0_71 = arith.constant 0 : index
    %111 = vector.load %arg9[%c2_69, %c0_70, %c0_71] : memref<4x8x8xf32, #tpu.memory_space<vmem>>, vector<1x8x8xf32>
    %112 = vector.shape_cast %111 : vector<1x8x8xf32> to vector<8x8xf32>
    %113 = vector.shape_cast %110 : vector<8x8xf32> to vector<1x8x8xf32>
    tpu.vector_store %arg9[%c2_69, %c0_70, %c0_71], %113 {strides = array<i32>} : memref<4x8x8xf32, #tpu.memory_space<vmem>>, vector<1x8x8xf32>,
    %c2_72 = arith.constant 2 : index
    %c0_73 = arith.constant 0 : index
    %c0_74 = arith.constant 0 : index
    %114 = vector.load %arg7[%c2_72, %c0_73, %c0_74] : memref<4x8x1xf32, #tpu.memory_space<vmem>>, vector<1x8x1xf32>
    %115 = vector.shape_cast %114 : vector<1x8x1xf32> to vector<8x1xf32>
    %116 = vector.shape_cast %89 : vector<8x1xf32> to vector<1x8x1xf32>
    tpu.vector_store %arg7[%c2_72, %c0_73, %c0_74], %116 {strides = array<i32>} : memref<4x8x1xf32, #tpu.memory_space<vmem>>, vector<1x8x1xf32>,
    %117 = vector.extract_strided_slice %4 {offsets = [0, 24], sizes = [8, 8], strides = [1, 1]} : vector<8x32xbf16> to vector<8x8xbf16>
    %118 = vector.extract_strided_slice %6 {offsets = [0, 24], sizes = [8, 8], strides = [1, 1]} : vector<8x32xbf16> to vector<8x8xbf16>
    %119 = vector.extract_strided_slice %8 {offsets = [0, 24], sizes = [8, 8], strides = [1, 1]} : vector<8x32xbf16> to vector<8x8xbf16>
    %cst_75 = arith.constant dense<0.000000e+00> : vector<8x8xf32>
    %120 = tpu.matmul %117, %118, %cst_75 {dimension_numbers = #tpu.dot_dimension_numbers<[1], [1], [0], [0], [0, 0, 1, 0], [], []>} : vector<8x8xbf16>, vector<8x8xbf16>, vector<8x8xf32> -> vector<8x8xf32>
    %c3 = arith.constant 3 : index
    %c0_76 = arith.constant 0 : index
    %c0_77 = arith.constant 0 : index
    %121 = vector.load %arg7[%c3, %c0_76, %c0_77] : memref<4x8x1xf32, #tpu.memory_space<vmem>>, vector<1x8x1xf32>
    %122 = vector.shape_cast %121 : vector<1x8x1xf32> to vector<8x1xf32>
    %cst_78 = arith.constant dense<0xFF800000> : vector<8xf32>
    %123 = vector.multi_reduction <maximumf>, %120, %cst_78 [1] : vector<8x8xf32> to vector<8xf32>
    %124 = vector.shape_cast %123 : vector<8xf32> to vector<8x1xf32>
    %125 = arith.maximumf %122, %124 : vector<8x1xf32>
    %126 = arith.subf %122, %125 : vector<8x1xf32>
    %127 = math.exp %126 : vector<8x1xf32>
    %128 = vector.broadcast %125 : vector<8x1xf32> to vector<8x8xf32>
    %129 = arith.subf %120, %128 : vector<8x8xf32>
    %130 = math.exp %129 : vector<8x8xf32>
    %c3_79 = arith.constant 3 : index
    %c0_80 = arith.constant 0 : index
    %c0_81 = arith.constant 0 : index
    %131 = vector.load %arg8[%c3_79, %c0_80, %c0_81] : memref<4x8x1xf32, #tpu.memory_space<vmem>>, vector<1x8x1xf32>
    %132 = vector.shape_cast %131 : vector<1x8x1xf32> to vector<8x1xf32>
    %133 = arith.mulf %127, %132 : vector<8x1xf32>
    %cst_82 = arith.constant dense<0.000000e+00> : vector<8xf32>
    %134 = vector.multi_reduction <add>, %130, %cst_82 [1] : vector<8x8xf32> to vector<8xf32>
    %135 = vector.shape_cast %134 : vector<8xf32> to vector<8x1xf32>
    %136 = arith.addf %133, %135 : vector<8x1xf32>
    %c3_83 = arith.constant 3 : index
    %c0_84 = arith.constant 0 : index
    %c0_85 = arith.constant 0 : index
    %137 = vector.load %arg8[%c3_83, %c0_84, %c0_85] : memref<4x8x1xf32, #tpu.memory_space<vmem>>, vector<1x8x1xf32>
    %138 = vector.shape_cast %137 : vector<1x8x1xf32> to vector<8x1xf32>
    %139 = vector.shape_cast %136 : vector<8x1xf32> to vector<1x8x1xf32>
    tpu.vector_store %arg8[%c3_83, %c0_84, %c0_85], %139 {strides = array<i32>} : memref<4x8x1xf32, #tpu.memory_space<vmem>>, vector<1x8x1xf32>,
    %c3_86 = arith.constant 3 : index
    %c0_87 = arith.constant 0 : index
    %c0_88 = arith.constant 0 : index
    %140 = vector.load %arg9[%c3_86, %c0_87, %c0_88] : memref<4x8x8xf32, #tpu.memory_space<vmem>>, vector<1x8x8xf32>
    %141 = vector.shape_cast %140 : vector<1x8x8xf32> to vector<8x8xf32>
    %142 = vector.broadcast %127 : vector<8x1xf32> to vector<8x8xf32>
    %143 = arith.mulf %142, %141 : vector<8x8xf32>
    %144 = arith.truncf %130 : vector<8x8xf32> to vector<8x8xbf16>
    %cst_89 = arith.constant dense<0.000000e+00> : vector<8x8xf32>
    %145 = tpu.matmul %144, %119, %cst_89 {dimension_numbers = #tpu.dot_dimension_numbers<[1], [0], [0], [1], [0, 0, 1, 1], [], []>} : vector<8x8xbf16>, vector<8x8xbf16>, vector<8x8xf32> -> vector<8x8xf32>
    %146 = arith.addf %143, %145 : vector<8x8xf32>
    %c3_90 = arith.constant 3 : index
    %c0_91 = arith.constant 0 : index
    %c0_92 = arith.constant 0 : index
    %147 = vector.load %arg9[%c3_90, %c0_91, %c0_92] : memref<4x8x8xf32, #tpu.memory_space<vmem>>, vector<1x8x8xf32>
    %148 = vector.shape_cast %147 : vector<1x8x8xf32> to vector<8x8xf32>
    %149 = vector.shape_cast %146 : vector<8x8xf32> to vector<1x8x8xf32>
    tpu.vector_store %arg9[%c3_90, %c0_91, %c0_92], %149 {strides = array<i32>} : memref<4x8x8xf32, #tpu.memory_space<vmem>>, vector<1x8x8xf32>,
    %c3_93 = arith.constant 3 : index
    %c0_94 = arith.constant 0 : index
    %c0_95 = arith.constant 0 : index
    %150 = vector.load %arg7[%c3_93, %c0_94, %c0_95] : memref<4x8x1xf32, #tpu.memory_space<vmem>>, vector<1x8x1xf32>
    %151 = vector.shape_cast %150 : vector<1x8x1xf32> to vector<8x1xf32>
    %152 = vector.shape_cast %125 : vector<8x1xf32> to vector<1x8x1xf32>
    tpu.vector_store %arg7[%c3_93, %c0_94, %c0_95], %152 {strides = array<i32>} : memref<4x8x1xf32, #tpu.memory_space<vmem>>, vector<1x8x1xf32>,
    %c0_i32_96 = arith.constant 0 : i32
    %153 = arith.cmpi eq, %arg2, %c0_i32_96 : i32
    %154 = arith.extui %153 : i1 to i32
    %c0_i32_97 = arith.constant 0 : i32
    %155 = arith.cmpi ne, %154, %c0_i32_97 : i32
    scf.if %155 {
      %c0_98 = arith.constant 0 : index
      %c0_99 = arith.constant 0 : index
      %c0_100 = arith.constant 0 : index
      %156 = vector.load %arg8[%c0_98, %c0_99, %c0_100] : memref<4x8x1xf32, #tpu.memory_space<vmem>>, vector<1x8x1xf32>
      %157 = vector.shape_cast %156 : vector<1x8x1xf32> to vector<8x1xf32>
      %158 = tpu.reciprocal %157 {approx = true} : vector<8x1xf32> -> vector<8x1xf32>
      %159 = arith.mulf %157, %158 : vector<8x1xf32>
      %cst_101 = arith.constant 2.000000e+00 : f32
      %160 = vector.broadcast %cst_101 : f32 to vector<8x1xf32>
      %161 = arith.subf %160, %159 : vector<8x1xf32>
      %162 = arith.mulf %158, %161 : vector<8x1xf32>
      %c0_102 = arith.constant 0 : index
      %c0_103 = arith.constant 0 : index
      %c0_104 = arith.constant 0 : index
      %163 = vector.load %arg9[%c0_102, %c0_103, %c0_104] : memref<4x8x8xf32, #tpu.memory_space<vmem>>, vector<1x8x8xf32>
      %164 = vector.shape_cast %163 : vector<1x8x8xf32> to vector<8x8xf32>
      %165 = vector.broadcast %162 : vector<8x1xf32> to vector<8x8xf32>
      %166 = arith.mulf %164, %165 : vector<8x8xf32>
      %c1_105 = arith.constant 1 : index
      %c0_106 = arith.constant 0 : index
      %c0_107 = arith.constant 0 : index
      %167 = vector.load %arg8[%c1_105, %c0_106, %c0_107] : memref<4x8x1xf32, #tpu.memory_space<vmem>>, vector<1x8x1xf32>
      %168 = vector.shape_cast %167 : vector<1x8x1xf32> to vector<8x1xf32>
      %169 = tpu.reciprocal %168 {approx = true} : vector<8x1xf32> -> vector<8x1xf32>
      %170 = arith.mulf %168, %169 : vector<8x1xf32>
      %cst_108 = arith.constant 2.000000e+00 : f32
      %171 = vector.broadcast %cst_108 : f32 to vector<8x1xf32>
      %172 = arith.subf %171, %170 : vector<8x1xf32>
      %173 = arith.mulf %169, %172 : vector<8x1xf32>
      %c1_109 = arith.constant 1 : index
      %c0_110 = arith.constant 0 : index
      %c0_111 = arith.constant 0 : index
      %174 = vector.load %arg9[%c1_109, %c0_110, %c0_111] : memref<4x8x8xf32, #tpu.memory_space<vmem>>, vector<1x8x8xf32>
      %175 = vector.shape_cast %174 : vector<1x8x8xf32> to vector<8x8xf32>
      %176 = vector.broadcast %173 : vector<8x1xf32> to vector<8x8xf32>
      %177 = arith.mulf %175, %176 : vector<8x8xf32>
      %c2_112 = arith.constant 2 : index
      %c0_113 = arith.constant 0 : index
      %c0_114 = arith.constant 0 : index
      %178 = vector.load %arg8[%c2_112, %c0_113, %c0_114] : memref<4x8x1xf32, #tpu.memory_space<vmem>>, vector<1x8x1xf32>
      %179 = vector.shape_cast %178 : vector<1x8x1xf32> to vector<8x1xf32>
      %180 = tpu.reciprocal %179 {approx = true} : vector<8x1xf32> -> vector<8x1xf32>
      %181 = arith.mulf %179, %180 : vector<8x1xf32>
      %cst_115 = arith.constant 2.000000e+00 : f32
      %182 = vector.broadcast %cst_115 : f32 to vector<8x1xf32>
      %183 = arith.subf %182, %181 : vector<8x1xf32>
      %184 = arith.mulf %180, %183 : vector<8x1xf32>
      %c2_116 = arith.constant 2 : index
      %c0_117 = arith.constant 0 : index
      %c0_118 = arith.constant 0 : index
      %185 = vector.load %arg9[%c2_116, %c0_117, %c0_118] : memref<4x8x8xf32, #tpu.memory_space<vmem>>, vector<1x8x8xf32>
      %186 = vector.shape_cast %185 : vector<1x8x8xf32> to vector<8x8xf32>
      %187 = vector.broadcast %184 : vector<8x1xf32> to vector<8x8xf32>
      %188 = arith.mulf %186, %187 : vector<8x8xf32>
      %c3_119 = arith.constant 3 : index
      %c0_120 = arith.constant 0 : index
      %c0_121 = arith.constant 0 : index
      %189 = vector.load %arg8[%c3_119, %c0_120, %c0_121] : memref<4x8x1xf32, #tpu.memory_space<vmem>>, vector<1x8x1xf32>
      %190 = vector.shape_cast %189 : vector<1x8x1xf32> to vector<8x1xf32>
      %191 = tpu.reciprocal %190 {approx = true} : vector<8x1xf32> -> vector<8x1xf32>
      %192 = arith.mulf %190, %191 : vector<8x1xf32>
      %cst_122 = arith.constant 2.000000e+00 : f32
      %193 = vector.broadcast %cst_122 : f32 to vector<8x1xf32>
      %194 = arith.subf %193, %192 : vector<8x1xf32>
      %195 = arith.mulf %191, %194 : vector<8x1xf32>
      %c3_123 = arith.constant 3 : index
      %c0_124 = arith.constant 0 : index
      %c0_125 = arith.constant 0 : index
      %196 = vector.load %arg9[%c3_123, %c0_124, %c0_125] : memref<4x8x8xf32, #tpu.memory_space<vmem>>, vector<1x8x8xf32>
      %197 = vector.shape_cast %196 : vector<1x8x8xf32> to vector<8x8xf32>
      %198 = vector.broadcast %195 : vector<8x1xf32> to vector<8x8xf32>
      %199 = arith.mulf %197, %198 : vector<8x8xf32>
      %200 = tpu.concatenate %166, %177, %188, %199 in 1 : vector<8x8xf32>, vector<8x8xf32>, vector<8x8xf32>, vector<8x8xf32> -> vector<8x32xf32>
      %c0_126 = arith.constant 0 : index
      %c0_127 = arith.constant 0 : index
      %c0_128 = arith.constant 0 : index
      %201 = vector.load %arg6[%c0_126, %c0_127, %c0_128] : memref<1x8x32xf32, #tpu.memory_space<vmem>>, vector<1x8x32xf32>
      %202 = vector.shape_cast %201 : vector<1x8x32xf32> to vector<8x32xf32>
      %203 = vector.shape_cast %200 : vector<8x32xf32> to vector<1x8x32xf32>
      tpu.vector_store %arg6[%c0_126, %c0_127, %c0_128], %203 {strides = array<i32>} : memref<1x8x32xf32, #tpu.memory_space<vmem>>, vector<1x8x32xf32>,
    } else {
    }
    return
  }
  func.func @transform_0(%arg0: i32, %arg1: i32, %arg2: i32) -> (i32, i32, i32, i32) {
    %c0_i32 = arith.constant 0 : i32
    %c0_i32_0 = arith.constant 0 : i32
    %c0_i32_1 = arith.constant 0 : i32
    return %c0_i32, %arg0, %arg1, %c0_i32_0 : i32, i32, i32, i32
  }
  func.func @transform_1(%arg0: i32, %arg1: i32, %arg2: i32) -> (i32, i32, i32, i32) {
    %c1_i32 = arith.constant 1 : i32
    %c0_i32 = arith.constant 0 : i32
    %c0_i32_0 = arith.constant 0 : i32
    return %c1_i32, %arg0, %arg2, %c0_i32 : i32, i32, i32, i32
  }
  func.func @transform_2(%arg0: i32, %arg1: i32, %arg2: i32) -> (i32, i32, i32, i32) {
    %c2_i32 = arith.constant 2 : i32
    %c0_i32 = arith.constant 0 : i32
    %c0_i32_0 = arith.constant 0 : i32
    return %c2_i32, %arg0, %arg2, %c0_i32 : i32, i32, i32, i32
  }
  func.func @transform_3(%arg0: i32, %arg1: i32, %arg2: i32) -> (i32, i32, i32) {
    %c0_i32 = arith.constant 0 : i32
    %c0_i32_0 = arith.constant 0 : i32
    return %arg0, %arg1, %c0_i32 : i32, i32, i32
  }
}

</mosaic_0001>

<bundles_post_ra>
// kernel: self_attention_forward.2
= control target key start
LH: loop header
LB: loop body
LE: loop exit
PB: predicated region body
PF: predicated region fallthrough
CT: control target
= control target key end

     0   :  { %7 = vsyncpa [#allocation4], 0  ;;  %s733_s0 = inlined_call_operand.vmem [shape: bf16[16,32], index: 0, kind: input, shape index: {}]   ;;  %s734_s1 = inlined_call_operand.hbm [shape: bf16[3,32,32], index: 1, kind: input, shape index: {}]   ;;  %s735_s2 = inlined_call_operand.vmem [shape: bf16[3,16,32], index: 2, kind: output, shape index: {}]  }
   0x1   :  { %9 = vsyncpa [#allocation4 + $0x1], 0  ;;  %s637_s9 = smov 0   ;;  %s639_s10 = smov 0  }
   0x2   :  { %s641_s11 = smov 0   ;;  %s643_s12 = smov 0  }
   0x3   :  { %s645_s13 = smov 0   ;;  %s647_s14 = smov 0  }
   0x4 LB: > { %s447_s15 = sadd.s32 4294967295, %s617_s14   ;;  %s41_s16 = sadd.s32 1, %s613_s13  ;;  %s617_s14 = sphi %s647_s14, %s15_s14   ;;  %s613_s13 = sphi %s645_s13, %s742_s13   ;;  %s609_s12 = sphi %s643_s12, %s741_s12   ;;  %s605_s11 = sphi %s641_s11, %s740_s11   ;;  %s601_s10 = sphi %s639_s10, %s739_s10   ;;  %s597_s9 = sphi %s637_s9, %s738_s9  }
   0x5   : > { %p43_p0 = scmp.ge.s32.totalorder %s41_s16, 3  ;;  %s80_s17 = sadd.s32 1, %s605_s11 }
   0x6   : > { %p87_p1 = scmp.ne.s32.totalorder %s605_s11, %s601_s10  ;;  %p88_p2 = scmp.eq.s32.totalorder %s617_s14, 0 }
   0x7   : > { %s744_s16 = smov (%p43_p0, %s41_s16), 0  ;;  %p93_p4 = scmp.ne.s32.totalorder %s601_s10, %s597_s9 }
   0x8   : > { %p673_p3 = por %p88_p2, %p87_p1  ;;  %s73_s19 = ssub.s32 %s613_s13, %s744_s16 }
   0x9   : > { %p94_p5 = scmp.eq.s32.totalorder %s447_s15, 0  ;;  %p78_p6 = scmp.eq.s32.totalorder %s73_s19, 0 }
   0xa   : > { %p485_p8 = scmp.lt.s32.totalorder %s617_s14, 3  ;;  %s159_s22 = sand.u32 1, %s605_s11  }
   0xb   : > { %p680_p7 = por %p94_p5, %p93_p4  ;;  %s474_s23 = sshll.u32 %s613_s13, 4 }
   0xc   : > { %s686_s21 = scalar_select %p78_p6, %s605_s11, %s80_s17  }
   0xd   : > { %s452_s24 = sshll.u32 %s159_s22, 4  ;;  %s171_s27 = scalar_lea.hbm %s734_s1, %s474_s23 }
   0xe   : > { %s172_s28 = sshll.u32 %s171_s27, 4  ;;  %s163_s29 = scalar_lea.vmem [#allocation3], %s452_s24  ;;  %s173_s28 = int_to_ptr.hbm [resolvable:$true] %s172_s28 }
   0xf   : > { %s174_s30 = sshll.u32 %s163_s29, 4  ;;  %p482_p9 = pnand %p485_p8, %p673_p3  ;;  %s175_s30 = int_to_ptr.vmem [resolvable:$true] %s174_s30 }
  0x10   : > { %p455_p10 = scmp.ge.s32.totalorder %s617_s14, 1  ;;  %p182_p11 = scmp.lt.s32.totalorder %s617_s14, 4 }
  0x11   : > { %s160_s3 = scalar_lea.sflag [#allocation4], %s159_s22  ;;  %s619_s4 = smov 64  }
  0x12   : > { %s620_s5 = smov 4   ;;  %p183_p12 = pnand %p455_p10, %p182_p11 }
  0x13   : > { %484 = dma.hbm_to_vmem [thread:$0]  (!%p482_p9), %s173_s28, 256, %s175_s30, %s160_s3, %s619_s4, %s619_s4, %s620_s5  }
  0x14   : > { %186 = sbr.rel (%p183_p12) target bundleno = 181 (0xb5), region = 28  ;;  %s188_s6 = sand.u32 (!%p183_p12), 1, %s601_s10  }
  0x15   : > { %s456_s7 = sshll.u32 (!%p183_p12), %s188_s6, 4  ;;  %s189_s8 = scalar_lea.sflag (!%p183_p12), [#allocation4], %s188_s6 }
  0x16   : > { %s192_s9 = scalar_lea.vmem (!%p183_p12), [#allocation3], %s456_s7 }
  0x19   : > { %592 = dma.done.wait (%p680_p7), %s189_s8, 256  }
  0x1a   : > { %594 = vsyncadd (%p680_p7), %s189_s8, 4294967040  ;;  %vm257_vm0 = vcmask 261120   ;;  %v621_v0 = vmov 0.0   ;;  %v478_v1 = vld [vmem:[%s192_s9 + $0x8] sm:$0xff]  ;;  %v477_v2 = vld [vmem:[%s192_s9] sm:$0xff]  ;;  %p240_p13 = scmp.lt.s32.totalorder %s609_s12, 2 }
  0x1b   : > { %258 = vst.msk [vmem:[#allocation2] sm:$0xff] %vm257_vm0, %v621_v0  ;;  %295 = vmatpush.bf16.msra.mxu0 %v478_v1  ;;  %v476_v3 = vld [vmem:[%s733_s0] sm:$0xff]  ;;  %vm314_vm1 = vcmask 257024  }
  0x1c   : > { %259 = vst.msk [vmem:[#allocation2 + $0x8] sm:$0xff] %vm257_vm0, %v621_v0  ;;  %s746_s12 = smov (!%p240_p13, %s609_s12), 2 }
  0x1d   : > { %s475_s18 = sshll.u32 %s746_s12, 3 }
  0x1e   : > { %s250_s22 = scalar_lea.vmem %s735_s2, %s475_s18 }
  0x1f   : > { %296 = vmatpush.bf16.msra.mxu0 %v477_v2 }
  0x22   : > { %471 = vmatmul.msk.bf16.vlgmr.msra.gmra.mxu0 %vm257_vm0, %v476_v3  ;;  %v260_v4 = vld [vmem:[#allocation2] sm:$0xff] }
  0x23   : > { %v261_v7 = vld [vmem:[#allocation2 + $0x8] sm:$0xff] }
  0x9f   : > { %v298_v5 = vpop.f32.mrf.mxu0 }
  0xa0   : > { %v303_v6 = vadd.f32 %v298_v5, %v260_v4 }
  0xa2   : > { %305 = vst.msk [vmem:[#allocation2] sm:$0xff] %vm257_vm0, %v303_v6 }
  0xa7   : > { %v300_v8 = vpop.f32.mrf.mxu0 }
  0xa8   : > { %v304_v9 = vadd.f32 %v300_v8, %v261_v7 }
  0xa9   : > { %v310_v10 = vld [vmem:[#allocation2] sm:$0xff] }
  0xaa   : > { %v312_v11 = vpack.c.bf16 %v310_v10, %v310_v10  ;;  %306 = vst.msk [vmem:[#allocation2 + $0x8] sm:$0xff] %vm257_vm0, %v304_v9 }
  0xac   : > { %315 = vst.msk [vmem:[%s250_s22] sm:$0xf] %vm314_vm1, %v312_v11 }
  0xb1   : > { %v311_v12 = vld [vmem:[#allocation2 + $0x8] sm:$0xff] }
  0xb2   : > { %v313_v13 = vpack.c.bf16 %v311_v12, %v311_v12 }
  0xb4   : > { %316 = vst.msk [vmem:[%s250_s22 + $0x4] sm:$0xf] %vm314_vm1, %v313_v13 }
  0xb5 PF: > { %s15_s14 = sadd.s32 1, %s617_s14   ;;  %s738_s9 = smov %s601_s10 }
  0xb6   : > { %p12_p0 = scmp.ge.s32.totalorder %s15_s14, 5   ;;  %s739_s10 = smov %s605_s11 }
  0xb7   : > { %s740_s11 = smov %s686_s21  ;;  %s741_s12 = smov %s613_s13 }
  0xb8   : > { %s742_s13 = smov %s744_s16  ;;  %14 = sbr.rel (!%p12_p0) target bundleno = 4 (0x4), region = 79 }
  0xbd   :  { %353 = vsyncpa [#allocation4], 1 }
  0xbe   :  { %355 = vsyncpa [#allocation4 + $0x1], 1 }

// kernel: self_attention_forward.3
= control target key start
LH: loop header
LB: loop body
LE: loop exit
PB: predicated region body
PF: predicated region fallthrough
CT: control target
= control target key end

     0   :  { %s932_s12 = smov 0   ;;  %s934_s13 = smov 0   ;;  %s1069_s0 = inlined_call_operand.vmem [shape: bf16[3,2,8,32], index: 0, kind: input, shape index: {}, may-alias: {0,1,2}]   ;;  %s1070_s1 = inlined_call_operand.vmem [shape: bf16[3,2,8,32], index: 1, kind: input, shape index: {}, may-alias: {0,1,2}]   ;;  %s1071_s2 = inlined_call_operand.vmem [shape: bf16[3,2,8,32], index: 2, kind: input, shape index: {}, may-alias: {0,1,2}]   ;;  %s1072_s3 = inlined_call_operand.vmem [shape: f32[2,8,32], index: 3, kind: output, shape index: {}]  }
   0x1   :  { %s936_s14 = smov 0  }
   0x2 LB: > { %s32_s15 = sadd.s32 1, %s897_s13  ;;  %p802_p0 = scmp.ge.s32.totalorder %s901_s14, 1  ;;  %s901_s14 = sphi %s936_s14, %s13_s14   ;;  %s897_s13 = sphi %s934_s13, %s1074_s13   ;;  %s893_s12 = sphi %s932_s12, %s1073_s12  }
   0x3   : > { %p34_p1 = scmp.ge.s32.totalorder %s32_s15, 2  ;;  %p192_p2 = scmp.lt.s32.totalorder %s901_s14, 3 }
   0x5   : > { %s1076_s15 = smov (%p34_p1, %s32_s15), 0  ;;  %p193_p3 = pnand %p802_p0, %p192_p2 }
   0x6   : > { %p236_p4 = scmp.lt.s32.totalorder (!%p193_p3), %s893_s12, 1  ;;  %s904_s23 = smov (!%p193_p3), 112  }
   0x7   : > { %196 = sbr.rel (%p193_p3) target bundleno = 1127 (0x467), region = 32  ;;  %s905_s24 = smov (!%p193_p3), 104  }
   0x8   : > { %s906_s25 = smov (!%p193_p3), 120   ;;  %s909_s29 = smov (!%p193_p3), 8  }
   0x9   : > { %s910_s30 = smov (!%p193_p3), 24   ;;  %s911_s4 = smov (!%p193_p3), 16  }
   0xc   : > { %s1078_s12 = smov (!%p236_p4, %s893_s12), 1  ;;  %vm280_vm0 = vcmask 64512   ;;  %vm271_vm1 = vcmask 7168   ;;  %v903_v3 = vmov -inf   ;;  %v907_v11 = vmov 0  }
   0xd   : > { %s953_s16 = sshll.u32 %s1078_s12, 2  ;;  %272 = vst.msk [vmem:[#allocation2] sm:$0xff] %vm271_vm1, %v903_v3  ;;  %852 = vset.pattern.permute.xlu1 %v907_v11  ;;  %853 = vset.pattern.permute.xlu2 %v907_v11  ;;  %v908_v12 = vmov 0.0   ;;  %vm343_vm2 = vcmask 1043456   ;;  %s806_s5 = sshll.u32 %s1078_s12, 3  ;;  %vm679_vm3 = vcmask 130048  }
   0xe   : > { %s740_s19 = scalar_lea.vmem %s1070_s1, %s953_s16  ;;  %s242_s22 = scalar_lea.vmem %s1069_s0, %s953_s16  ;;  %273 = vst.msk [vmem:[#allocation2 + $0x8] sm:$0xff] %vm271_vm1, %v903_v3  ;;  %854 = vset.pattern.permute.xlu0 %v907_v11  ;;  %vm681_vm4 = vcmask 195584   ;;  %vm683_vm5 = vcmask 261120  }
   0xf   : > { %v807_v0 = vld [vmem:[%s740_s19 + $0x8] sm:$0xf]  ;;  %v285_v2 = vld [vmem:[%s242_s22] sm:$0xf]  ;;  %274 = vst.msk [vmem:[#allocation2 + $0x10] sm:$0xff] %vm271_vm1, %v903_v3  ;;  %s744_s28 = scalar_lea.vmem %s1071_s2, %s953_s16  ;;  %s265_s8 = scalar_lea.vmem %s1072_s3, %s806_s5 }
  0x10   : > { %v293_v1 = vsel %vm280_vm0, %v807_v0, 0  ;;  %275 = vst.msk [vmem:[#allocation2 + $0x18] sm:$0xff] %vm271_vm1, %v903_v3  ;;  %v369_v4 = vunpack.c.l.b16 %v807_v0  ;;  %v364_v9 = vunpack.c.l.b16 %v285_v2  ;;  %v808_v14 = vld [vmem:[%s744_s28 + $0x10] sm:$0xf] }
  0x11   : > { %302 = vmatpush.bf16.xpose.msra.mxu0 %v293_v1  ;;  %276 = vst.msk [vmem:[#allocation3] sm:$0xff] %vm271_vm1, %v908_v12  ;;  %v345_v15 = vsel %vm343_vm2, %v808_v14, 0  ;;  %v427_v43 = vunpack.c.l.b16 %v808_v14 }
  0x12   : > { %v370_v5 = vpack.c.b16 %v369_v4, %v369_v4  ;;  %v365_v10 = vpack.c.b16 %v364_v9, %v364_v9  ;;  %277 = vst.msk [vmem:[#allocation3 + $0x8] sm:$0xff] %vm271_vm1, %v908_v12  ;;  %354 = vmatpush.bf16.msra.mxu1 %v345_v15 }
  0x13   : > { %278 = vst.msk [vmem:[#allocation3 + $0x10] sm:$0xff] %vm271_vm1, %v908_v12  ;;  %v428_v44 = vpack.c.b16 %v427_v43, %v427_v43 }
  0x14   : > { %455 = vrot.lane.b32.xlu2 %v370_v5, %s904_s23  ;;  %279 = vst.msk [vmem:[#allocation3 + $0x18] sm:$0xff] %vm271_vm1, %v908_v12  ;;  %v988_v17 = vld [vmem:[#allocation2] sm:$0xff] }
  0x15   : > { %281 = vst.msk [vmem:[#allocation4] sm:$0xff] %vm280_vm0, %v908_v12  ;;  %v393_v51 = vld [vmem:[#allocation2 + $0x8] sm:$0xff] }
  0x16   : > { %282 = vst.msk [vmem:[#allocation4 + $0x8] sm:$0xff] %vm280_vm0, %v908_v12  ;;  %v477_v55 = vld [vmem:[#allocation2 + $0x10] sm:$0xff] }
  0x17   : > { %283 = vst.msk [vmem:[#allocation4 + $0x10] sm:$0xff] %vm280_vm0, %v908_v12  ;;  %v1017_v47 = vld [vmem:[#allocation2 + $0x18] sm:$0xff] }
  0x18   : > { %809 = vmatmul.msk.bf16.vlgmr.msra.gmra.mxu0 %vm280_vm0, %v285_v2  ;;  %284 = vst.msk [vmem:[#allocation4 + $0x18] sm:$0xff] %vm280_vm0, %v908_v12  ;;  %v324_v63 = vld [vmem:[#allocation3] sm:$0xff] }
  0x1c   : > { %536 = vrot.lane.b32.xlu2 %v370_v5, %s905_s24 }
  0x24   : > { %534 = vrot.lane.b32.xlu2 %v365_v10, %s905_s24 }
  0x6e   : > { %v456_v13 = vpop.permute.xlu2 %455 }
  0x6f   : > { %v461_v16 = vsel %vm280_vm0, %v456_v13, 0 }
  0x70   : > { %470 = vmatpush.bf16.xpose.msrb.mxu1 %v461_v16 }
  0x76   : > { %v537_v23 = vpop.permute.xlu2 %536 }
  0x77   : > { %v542_v24 = vsel %vm280_vm0, %v537_v23, 0 }
  0x78   : > { %551 = vmatpush.bf16.xpose.msrb.mxu0 %v542_v24 }
  0x7e   : > { %v535_v25 = vpop.permute.xlu2 %534 }
  0x7f   : > { %815 = vmatmul.msk.bf16.vlgmr.msrb.gmra.mxu0 %vm280_vm0, %v535_v25 }
  0x95   : > { %v304_v6 = vpop.f32.mrf.mxu0 }
  0x96   : > { %v309_v7 = vsel %vm280_vm0, %v304_v6, -inf }
  0x97   : > { %310 = vmax.xlane.f32.xlu0 %v309_v7 }
  0x9d   : > { %v306_v8 = vpop.f32.mrf.mxu0 }
  0xab   : > { %371 = vrot.lane.b32.xlu0 %v370_v5, %s906_s25 }
  0xfc   : > { %v553_v33 = vpop.f32.mrf.mxu0 }
  0xfd   : > { %v559_v35 = vsel %vm280_vm0, %v553_v33, -inf }
  0xfe   : > { %560 = vmax.xlane.f32.xlu0 %v559_v35 }
 0x104   : > { %v555_v34 = vpop.f32.mrf.mxu0 }
 0x10a   : > { %v311_v18 = vpop.xlane.xlu0 %310 }
 0x10b   : > { %v991_v19 = vmax.f32 %v988_v17, %v311_v18 }
 0x10d   : > { %v313_v20 = vsub.f32 %v988_v17, %v991_v19  ;;  %362 = vst.msk [vmem:[#allocation2] sm:$0xff] %vm271_vm1, %v991_v19  ;;  %318 = vperm.xlu1 %852, %v991_v19  }
 0x10f   : > { %v314_v60 = vmul.f32 1.442695, %v313_v20 }
 0x115   : > { %366 = vrot.lane.b32.xlu1 %v365_v10, %s906_s25 }
 0x11d   : > { %453 = vrot.lane.b32.xlu1 %v365_v10, %s904_s23  ;;  %v372_v21 = vpop.permute.xlu0 %371 }
 0x11e   : > { %v377_v22 = vsel %vm280_vm0, %v372_v21, 0 }
 0x11f   : > { %386 = vmatpush.bf16.xpose.msra.mxu2 %v377_v22 }
 0x171   : > { %v561_v48 = vpop.xlane.xlu0 %560 }
 0x172   : > { %v1020_v49 = vmax.f32 %v1017_v47, %v561_v48 }
 0x174   : > { %v563_v50 = vsub.f32 %v1017_v47, %v1020_v49  ;;  %614 = vst.msk [vmem:[#allocation2 + $0x18] sm:$0xff] %vm271_vm1, %v1020_v49 }
 0x176   : > { %v564_v34 = vmul.f32 1.442695, %v563_v50 }
 0x17f   : > { %v319_v26 = vpop.permute.xlu1 %318 }
 0x180   : > { %v321_v27 = vsub.f32 %v304_v6, %v319_v26 }
 0x182   : > { %v322_v28 = vmul.f32 1.442695, %v321_v27 }
 0x184   : > { %855 = vpow2.f32 %v322_v28 }
 0x185   : > { %857 = vpow2.f32 %v314_v60 }
 0x187   : > { %v367_v29 = vpop.permute.xlu1 %366 }
 0x188   : > { %811 = vmatmul.msk.bf16.vlgmr.msra.gmra.mxu2 %vm280_vm0, %v367_v29 }
 0x18a   : > { %v856_v30 = vpop.eup %855 }
 0x18b   : > { %v339_v31 = vpack.c.bf16 %v856_v30, %v856_v30  ;;  %v326_v46 = vsel %vm280_vm0, %v856_v30, 0.0  ;;  %v858_v62 = vpop.eup %857 }
 0x18c   : > { %v325_v1 = vmul.f32 %v858_v62, %v324_v63  ;;  %v494_v63 = vld [vmem:[#allocation3 + $0x10] sm:$0xff] }
 0x18d   : > { %810 = vmatmul.msk.bf16.vlgmr.msra.gmra.mxu1 %vm280_vm0, %v339_v31 }
 0x18f   : > { %v454_v32 = vpop.permute.xlu1 %453 }
 0x19d   : > { %813 = vmatmul.msk.bf16.vlgmr.msrb.gmra.mxu1 %vm280_vm0, %v454_v32 }
 0x20a   : > { %v1007_v36 = vpop.f32.mrf.mxu1 }
 0x20b   : > { %v388_v37 = vpop.f32.mrf.mxu2 }
 0x20c   : > { %v394_v38 = vsel %vm280_vm0, %v388_v37, -inf }
 0x20d   : > { %395 = vmax.xlane.f32.xlu1 %v394_v38 }
 0x212   : > { %v358_v39 = vpop.f32.mrf.mxu1 }
 0x213   : > { %v390_v40 = vpop.f32.mrf.mxu2 }
 0x21a   : > { %v1010_v41 = vpop.f32.mrf.mxu1 }
 0x21b   : > { %v478_v42 = vsel %vm280_vm0, %v1010_v41, -inf }
 0x21c   : > { %479 = vmax.xlane.f32.xlu2 %v478_v42 }
 0x222   : > { %v474_v45 = vpop.f32.mrf.mxu1 }
 0x226   : > { %429 = vrot.lane.b32.xlu1 %v428_v44, %s906_s25 }
 0x22e   : > { %510 = vrot.lane.b32.xlu1 %v428_v44, %s904_s23 }
 0x258   : > { %327 = vadd.xlane.f32.xlu1 %v326_v46 }
 0x280   : > { %v396_v52 = vpop.xlane.xlu1 %395 }
 0x281   : > { %v397_v53 = vmax.f32 %v393_v51, %v396_v52 }
 0x283   : > { %v398_v54 = vsub.f32 %v393_v51, %v397_v53  ;;  %452 = vst.msk [vmem:[#allocation2 + $0x8] sm:$0xff] %vm271_vm1, %v397_v53  ;;  %403 = vperm.xlu2 %853, %v397_v53  }
 0x285   : > { %v399_v24 = vmul.f32 1.442695, %v398_v54 }
 0x28b   : > { %568 = vperm.xlu2 %853, %v1020_v49  }
 0x28f   : > { %v480_v56 = vpop.xlane.xlu2 %479 }
 0x290   : > { %v481_v57 = vmax.f32 %v477_v55, %v480_v56 }
 0x292   : > { %v482_v58 = vsub.f32 %v477_v55, %v481_v57  ;;  %533 = vst.msk [vmem:[#allocation2 + $0x10] sm:$0xff] %vm271_vm1, %v481_v57  ;;  %487 = vperm.xlu0 %854, %v481_v57   ;;  %v418_v57 = vld [vmem:[#allocation4 + $0x8] sm:$0xff] }
 0x293   : > { %591 = vrot.lane.b32.xlu2 %v428_v44, %s905_s24 }
 0x294   : > { %v483_v20 = vmul.f32 1.442695, %v482_v58 }
 0x298   : > { %v430_v59 = vpop.permute.xlu1 %429 }
 0x299   : > { %v435_v0 = vsel %vm343_vm2, %v430_v59, 0 }
 0x29a   : > { %444 = vmatpush.bf16.msra.mxu3 %v435_v0 }
 0x2a0   : > { %v511_v61 = vpop.permute.xlu1 %510 }
 0x2a1   : > { %v516_v13 = vsel %vm343_vm2, %v511_v61, 0 }
 0x2a2   : > { %525 = vmatpush.bf16.msrb.mxu3 %v516_v13 }
 0x2cb   : > { %v328_v2 = vpop.xlane.xlu1 %327 }
 0x2cc   : > { %v329_v3 = vadd.f32 %v328_v2, %v325_v1 }
 0x2ce   : > { %331 = vst.msk [vmem:[#allocation3] sm:$0xff] %vm271_vm1, %v329_v3  ;;  %v332_v3 = vld [vmem:[#allocation4] sm:$0xff] }
 0x2d5   : > { %v618_v17 = vld [vmem:[#allocation3] sm:$0xff] }
 0x2dd   : > { %v404_v4 = vpop.permute.xlu2 %403 }
 0x2de   : > { %v406_v5 = vsub.f32 %v388_v37, %v404_v4  ;;  %v410_v37 = vld [vmem:[#allocation3 + $0x8] sm:$0xff] }
 0x2e0   : > { %v407_v6 = vmul.f32 1.442695, %v406_v5 }
 0x2e2   : > { %859 = vpow2.f32 %v407_v6 }
 0x2e5   : > { %v569_v7 = vpop.permute.xlu2 %568 }
 0x2e6   : > { %v571_v8 = vsub.f32 %v553_v33, %v569_v7 }
 0x2e8   : > { %v860_v9 = vpop.eup %859  ;;  %v572_v10 = vmul.f32 1.442695, %v571_v8  ;;  %v502_v8 = vld [vmem:[#allocation4 + $0x10] sm:$0xff] }
 0x2e9   : > { %v412_v11 = vsel %vm280_vm0, %v860_v9, 0.0  ;;  %v425_v12 = vpack.c.bf16 %v860_v9, %v860_v9 }
 0x2ea   : > { %861 = vpow2.f32 %v572_v10  ;;  %413 = vadd.xlane.f32.xlu0 %v412_v11  ;;  %v583_v10 = vld [vmem:[#allocation4 + $0x18] sm:$0xff] }
 0x2eb   : > { %812 = vmatmul.msk.bf16.vlgmr.msra.gmra.mxu3 %vm280_vm0, %v425_v12  ;;  %863 = vrcp.f32 %v618_v17 }
 0x2ec   : > { %865 = vpow2.f32 %v483_v20 }
 0x2ed   : > { %v592_v14 = vpop.permute.xlu2 %591  ;;  %867 = vpow2.f32 %v399_v24 }
 0x2ee   : > { %v597_v15 = vsel %vm343_vm2, %v592_v14, 0 }
 0x2ef   : > { %606 = vmatpush.bf16.msrb.mxu2 %v597_v15 }
 0x2f0   : > { %v862_v16 = vpop.eup %861 }
 0x2f1   : > { %v577_v18 = vsel %vm280_vm0, %v862_v16, 0.0  ;;  %v590_v19 = vpack.c.bf16 %v862_v16, %v862_v16  ;;  %v864_v21 = vpop.eup %863 }
 0x2f2   : > { %578 = vadd.xlane.f32.xlu1 %v577_v18  ;;  %v620_v22 = vmul.f32 %v864_v21, %v618_v17  ;;  %v866_v23 = vpop.eup %865 }
 0x2f3   : > { %816 = vmatmul.msk.bf16.vlgmr.msrb.gmra.mxu2 %vm280_vm0, %v590_v19  ;;  %v868_v30 = vpop.eup %867  ;;  %v495_v0 = vmul.f32 %v866_v23, %v494_v63 }
 0x2f4   : > { %v621_v25 = vsub.f32 2.0, %v620_v22  ;;  %v411_v38 = vmul.f32 %v868_v30, %v410_v37 }
 0x2f6   : > { %v622_v27 = vmul.f32 %v864_v21, %v621_v25 }
 0x2fe   : > { %505 = vperm.xlu0 %854, %v866_v23  }
 0x304   : > { %v488_v26 = vpop.permute.xlu0 %487 }
 0x305   : > { %v490_v28 = vsub.f32 %v1010_v41, %v488_v26  ;;  %v575_v41 = vld [vmem:[#allocation3 + $0x18] sm:$0xff] }
 0x306   : > { %626 = vperm.xlu0 %854, %v622_v27  }
 0x307   : > { %v491_v29 = vmul.f32 1.442695, %v490_v28 }
 0x309   : > { %869 = vpow2.f32 %v491_v29 }
 0x30a   : > { %871 = vpow2.f32 %v564_v34 }
 0x30b   : > { %421 = vperm.xlu1 %852, %v868_v30  }
 0x30f   : > { %v870_v31 = vpop.eup %869 }
 0x310   : > { %v496_v32 = vsel %vm280_vm0, %v870_v31, 0.0  ;;  %v509_v33 = vpack.c.bf16 %v870_v31, %v870_v31  ;;  %v872_v35 = vpop.eup %871 }
 0x311   : > { %497 = vadd.xlane.f32.xlu2 %v496_v32  ;;  %v576_v42 = vmul.f32 %v872_v35, %v575_v41 }
 0x312   : > { %814 = vmatmul.msk.bf16.vlgmr.msrb.gmra.mxu3 %vm280_vm0, %v509_v33 }
 0x329   : > { %335 = vperm.xlu2 %853, %v858_v62  }
 0x331   : > { %586 = vperm.xlu2 %853, %v872_v35  }
 0x35d   : > { %v414_v39 = vpop.xlane.xlu0 %413 }
 0x35e   : > { %v415_v40 = vadd.f32 %v414_v39, %v411_v38 }
 0x360   : > { %416 = vst.msk [vmem:[#allocation3 + $0x8] sm:$0xff] %vm271_vm1, %v415_v40 }
 0x365   : > { %v579_v43 = vpop.xlane.xlu1 %578 }
 0x366   : > { %v580_v44 = vadd.f32 %v579_v43, %v576_v42 }
 0x367   : > { %v630_v45 = vld [vmem:[#allocation3 + $0x8] sm:$0xff] }
 0x368   : > { %581 = vst.msk [vmem:[#allocation3 + $0x18] sm:$0xff] %vm271_vm1, %v580_v44  ;;  %873 = vrcp.f32 %v630_v45 }
 0x36e   : > { %v874_v46 = vpop.eup %873  ;;  %v446_v47 = vpop.f32.mrf.mxu3 }
 0x36f   : > { %v632_v48 = vmul.f32 %v874_v46, %v630_v45  ;;  %v654_v49 = vld [vmem:[#allocation3 + $0x18] sm:$0xff] }
 0x370   : > { %875 = vrcp.f32 %v654_v49  ;;  %v506_v9 = vpop.permute.xlu0 %505 }
 0x371   : > { %v633_v50 = vsub.f32 2.0, %v632_v48  ;;  %v508_v11 = vmul.f32 %v506_v9, %v502_v8 }
 0x373   : > { %v634_v51 = vmul.f32 %v874_v46, %v633_v50 }
 0x375   : > { %638 = vperm.xlu1 %852, %v634_v51  }
 0x376   : > { %v876_v52 = vpop.eup %875  ;;  %v448_v53 = vpop.f32.mrf.mxu3 }
 0x377   : > { %v608_v54 = vpop.f32.mrf.mxu2  ;;  %v656_v55 = vmul.f32 %v876_v52, %v654_v49 }
 0x378   : > { %v627_v21 = vpop.permute.xlu0 %626 }
 0x379   : > { %v657_v56 = vsub.f32 2.0, %v656_v55 }
 0x37b   : > { %v658_v58 = vmul.f32 %v876_v52, %v657_v56 }
 0x37d   : > { %v422_v59 = vpop.permute.xlu1 %421  ;;  %662 = vperm.xlu0 %854, %v658_v58  }
 0x37e   : > { %v424_v60 = vmul.f32 %v422_v59, %v418_v57 }
 0x37f   : > { %v610_v61 = vpop.f32.mrf.mxu2 }
 0x380   : > { %v450_v62 = vadd.f32 %v446_v47, %v424_v60 }
 0x382   : > { %451 = vst.msk [vmem:[#allocation4 + $0x8] sm:$0xff] %vm280_vm0, %v450_v62 }
 0x384   : > { %v498_v1 = vpop.xlane.xlu2 %497 }
 0x385   : > { %v499_v2 = vadd.f32 %v498_v1, %v495_v0 }
 0x387   : > { %500 = vst.msk [vmem:[#allocation3 + $0x10] sm:$0xff] %vm271_vm1, %v499_v2 }
 0x389   : > { %v635_v22 = vld [vmem:[#allocation4 + $0x8] sm:$0xff] }
 0x38c   : > { %v336_v4 = vpop.permute.xlu2 %335 }
 0x38d   : > { %v338_v5 = vmul.f32 %v336_v4, %v332_v3 }
 0x38e   : > { %v642_v6 = vld [vmem:[#allocation3 + $0x10] sm:$0xff] }
 0x38f   : > { %v360_v7 = vadd.f32 %v1007_v36, %v338_v5  ;;  %877 = vrcp.f32 %v642_v6 }
 0x391   : > { %361 = vst.msk [vmem:[#allocation4] sm:$0xff] %vm280_vm0, %v360_v7 }
 0x394   : > { %v587_v12 = vpop.permute.xlu2 %586 }
 0x395   : > { %v878_v13 = vpop.eup %877  ;;  %v589_v14 = vmul.f32 %v587_v12, %v583_v10  ;;  %v527_v15 = vpop.f32.mrf.mxu3 }
 0x396   : > { %v531_v16 = vadd.f32 %v527_v15, %v508_v11  ;;  %v644_v17 = vmul.f32 %v878_v13, %v642_v6 }
 0x397   : > { %v612_v18 = vadd.f32 %v608_v54, %v589_v14 }
 0x398   : > { %532 = vst.msk [vmem:[#allocation4 + $0x10] sm:$0xff] %vm280_vm0, %v531_v16  ;;  %v645_v19 = vsub.f32 2.0, %v644_v17  ;;  %v623_v31 = vld [vmem:[#allocation4] sm:$0xff] }
 0x399   : > { %613 = vst.msk [vmem:[#allocation4 + $0x18] sm:$0xff] %vm280_vm0, %v612_v18  ;;  %v629_v33 = vmul.f32 %v627_v21, %v623_v31 }
 0x39a   : > { %v646_v36 = vmul.f32 %v878_v13, %v645_v19 }
 0x39c   : > { %650 = vperm.xlu2 %853, %v646_v36  }
 0x39d   : > { %v529_v20 = vpop.f32.mrf.mxu3 }
 0x39f   : > { %v647_v29 = vld [vmem:[#allocation4 + $0x10] sm:$0xff] }
 0x3a0   : > { %v659_v25 = vld [vmem:[#allocation4 + $0x18] sm:$0xff] }
 0x3e7   : > { %v639_v23 = vpop.permute.xlu1 %638 }
 0x3e8   : > { %v641_v24 = vmul.f32 %v639_v23, %v635_v22 }
 0x3ea   : > { %667 = vrot.lane.b32.xlu1 %v641_v24, %s909_s29 }
 0x3ef   : > { %v663_v26 = vpop.permute.xlu0 %662 }
 0x3f0   : > { %v665_v27 = vmul.f32 %v663_v26, %v659_v25 }
 0x3f2   : > { %675 = vrot.lane.b32.xlu0 %v665_v27, %s910_s30 }
 0x3f6   : > { %v651_v28 = vpop.permute.xlu2 %650 }
 0x3f7   : > { %v653_v30 = vmul.f32 %v651_v28, %v647_v29 }
 0x3f9   : > { %671 = vrot.lane.b32.xlu2 %v653_v30, %s911_s4 }
 0x453   : > { %v672_v35 = vpop.permute.xlu2 %671 }
 0x45c   : > { %v668_v32 = vpop.permute.xlu1 %667 }
 0x45d   : > { %v678_v34 = vsel %vm280_vm0, %v629_v33, %v668_v32 }
 0x45e   : > { %v680_v37 = vsel %vm679_vm3, %v678_v34, %v672_v35 }
 0x464   : > { %v676_v38 = vpop.permute.xlu0 %675 }
 0x465   : > { %v682_v39 = vsel %vm681_vm4, %v680_v37, %v676_v38 }
 0x466   : > { %684 = vst.msk [vmem:[%s265_s8] sm:$0xff] %vm683_vm5, %v682_v39 }
 0x467 PF: > { %s13_s14 = sadd.s32 1, %s901_s14   ;;  %s1073_s12 = smov %s897_s13 }
 0x468   : > { %p10_p5 = scmp.ge.s32.totalorder %s13_s14, 4   ;;  %s1074_s13 = smov %s1076_s15 }
 0x46a   :  { %12 = sbr.rel (!%p10_p5) target bundleno = 2 (0x2), region = 85 }

</bundles_post_ra>
